<compile_context>
chip_gen: v7x
topology: tpu7x:2x2x1
jax: 0.10.0
libtpu: 0.0.40
codegen_flags: <defaults>
</compile_context>

<pallas_src>
import math

import numpy as np
import jax
import jax.numpy as jnp
from jax.experimental import pallas as pl
from jax.experimental.pallas import tpu as pltpu


_MAX_INFLIGHT_DMAS = 4            # 2-4 DMAs in flight hide per-DMA latency.
_CHUNK_THRESHOLD_BYTES = 4 << 20  # Below ~4 MiB a single DMA is already optimal.


def _chunk_plan(shape, dtype):
    """Static (start, size) chunks along the leading dim; [] => whole-ref copy."""
    if len(shape) == 0 or shape[0] < 2 * _MAX_INFLIGHT_DMAS:
        return []
    total_bytes = math.prod(shape) * np.dtype(dtype).itemsize
    if total_bytes < _CHUNK_THRESHOLD_BYTES:
        return []
    lead = shape[0]
    n = _MAX_INFLIGHT_DMAS
    base, rem = divmod(lead, n)
    chunks, start = [], 0
    for c in range(n):
        size = base + (1 if c < rem else 0)
        chunks.append((start, size))
        start += size
    return chunks


def _make_copy_kernel(chunks):
    """HBM->HBM DMA copy kernel.  `chunks` is a static Python list."""

    def kernel(x_hbm, o_hbm, sems):
        if not chunks:
            # Single whole-ref DMA (small / oddly shaped inputs).
            cp = pltpu.make_async_copy(x_hbm, o_hbm, sems.at[0])
            cp.start()
            cp.wait()
            return
        descs = []
        for c, (start, size) in enumerate(chunks):
            cp = pltpu.make_async_copy(
                x_hbm.at[pl.ds(start, size)],
                o_hbm.at[pl.ds(start, size)],
                sems.at[c],
            )
            cp.start()            # put all chunks in flight ...
            descs.append(cp)
        for cp in descs:          # ... then drain.
            cp.wait()

    return kernel


def _materialized_copy(x):
    chunks = _chunk_plan(x.shape, x.dtype)
    n_sems = max(1, len(chunks))
    return pl.pallas_call(
        _make_copy_kernel(chunks),
        out_shape=jax.ShapeDtypeStruct(x.shape, x.dtype),
        in_specs=[pl.BlockSpec(memory_space=pl.ANY)],
        out_specs=pl.BlockSpec(memory_space=pl.ANY),
        scratch_shapes=[pltpu.SemaphoreType.DMA((n_sems,))],
    )(x)


def identity(x, materialize=False, return_numpy=False):
    """Pallas Identity matching torch Identity.forward.

    materialize=False (default): return x as-is — zero HBM traffic, exactly
    the PyTorch semantics (``y = x``).
    materialize=True: produce a fresh buffer via a direct HBM->HBM DMA copy
    kernel (no VMEM staging).
    """
    x = jnp.asarray(x)
    y = _materialized_copy(x) if materialize else x
    if return_numpy:
        # Mirrors `y.detach().numpy()` of the torch module (host-side only).
        return np.asarray(jax.device_get(y))
    return y


if __name__ == "__main__":
    key = jax.random.PRNGKey(0)
    x = jax.random.normal(key, (2, 4, 16, 16), dtype=jnp.float32)

    # Fast path: true Identity semantics — no kernel, no HBM traffic.
    y_fast = identity(x)
    jax.block_until_ready(y_fast)
    assert y_fast.shape == x.shape and y_fast.dtype == x.dtype
    assert bool(jnp.array_equal(y_fast, x))

    # Materialized path: runs the Pallas HBM->HBM DMA copy kernel once.
    y = identity(x, materialize=True)
    jax.block_until_ready(y)
    assert y.shape == x.shape and y.dtype == x.dtype
    assert bool(jnp.array_equal(y, x))

    # Lane/sublane-unaligned shape: no pad / reshape / slice on the DMA path.
    x2 = jax.random.normal(key, (3, 5, 7), dtype=jnp.float32)  # 105 elements
    y2 = identity(x2, materialize=True)
    jax.block_until_ready(y2)
    assert y2.shape == x2.shape and y2.dtype == x2.dtype
    assert bool(jnp.array_equal(y2, x2))

    # Larger input (8 MiB) exercises the 4-chunks-in-flight DMA path.
    x3 = jax.random.normal(key, (2048, 1024), dtype=jnp.float32)
    y3 = identity(x3, materialize=True)
    jax.block_until_ready(y3)
    assert y3.shape == x3.shape and y3.dtype == x3.dtype
    assert bool(jnp.array_equal(y3, x3))

    print("KERNEL_OK")
</pallas_src>

<mosaic_0001>
module attributes {stable_mosaic.version = 11 : i64} {
  func.func @kernel(%arg0: memref<2x4x16x16xf32, #tpu.memory_space<any>>, %arg1: memref<2x4x16x16xf32, #tpu.memory_space<any>>, %arg2: memref<1x!tpu.dma_semaphore, #tpu.memory_space<semaphore_mem>>) attributes {dimension_semantics = [], scalar_prefetch = 0 : i64, scratch_operands = 1 : i64, tpu.core_type = #tpu.core_type<tc>} {
    %c0_i32 = arith.constant 0 : i32
    %0 = tpu.memref_slice %arg2[%c0_i32] : memref<1x!tpu.dma_semaphore, #tpu.memory_space<semaphore_mem>> -> memref<1x!tpu.dma_semaphore, #tpu.memory_space<semaphore_mem>>
    %1 = tpu.memref_squeeze %0 : memref<1x!tpu.dma_semaphore, #tpu.memory_space<semaphore_mem>> -> memref<!tpu.dma_semaphore, #tpu.memory_space<semaphore_mem>>
    tpu.enqueue_dma source(%arg0 : memref<2x4x16x16xf32, #tpu.memory_space<any>>) target(%arg1 : memref<2x4x16x16xf32, #tpu.memory_space<any>>) target_semaphore(%1 : memref<!tpu.dma_semaphore, #tpu.memory_space<semaphore_mem>>)
    %c0_i32_0 = arith.constant 0 : i32
    %2 = tpu.memref_slice %arg2[%c0_i32_0] : memref<1x!tpu.dma_semaphore, #tpu.memory_space<semaphore_mem>> -> memref<1x!tpu.dma_semaphore, #tpu.memory_space<semaphore_mem>>
    %3 = tpu.memref_squeeze %2 : memref<1x!tpu.dma_semaphore, #tpu.memory_space<semaphore_mem>> -> memref<!tpu.dma_semaphore, #tpu.memory_space<semaphore_mem>>
    tpu.wait_dma2 semaphore(%3 : memref<!tpu.dma_semaphore, #tpu.memory_space<semaphore_mem>>) src(%arg0 : memref<2x4x16x16xf32, #tpu.memory_space<any>>) dst(%arg1 : memref<2x4x16x16xf32, #tpu.memory_space<any>>)
    return
  }
}

</mosaic_0001>

<bundles_post_ra>
// kernel: tpu_custom_call.1
= control target key start
LH: loop header
LB: loop body
LE: loop exit
PB: predicated region body
PF: predicated region fallthrough
CT: control target
= control target key end

     0   :  { %s36_s6 = smov [#allocation2]   ;;  %s37_s7 = smov [#allocation3]   ;;  %s55_s0 = inlined_call_operand.hbm [shape: f32[2,4,16,16], index: 0, kind: input, shape index: {}]   ;;  %s56_s1 = inlined_call_operand.hbm [shape: f32[2,4,16,16], index: 1, kind: output, shape index: {}]  }
   0x1   :  { %s38_s8 = smov 0  }
   0x2   :  { %18 = dma.general %s55_s0, 2048, %s56_s1, %s36_s6, %s37_s7, [#allocation4], %s38_s8, 0  }
   0x3   :  { %34 = dma.done.wait [#allocation2], 2048 }
   0x4   :  { %35 = vsyncadd [#allocation2], 4294965248 }
   0x5   :  { %24 = vsyncmov [#allocation2] }
   0x8   :  { %s25_s13 = vpop.sfrf %24 }
   0x9   :  { %p30_p0 = scmp.ne.s32.totalorder %s25_s13, 0 }
   0xb   :  { %29 = shalt.err (%p30_p0)  }

</bundles_post_ra>
